<compile_context>
chip_gen: v6e
topology: v6e:2x2x1
jax: 0.10.0
libtpu: 0.0.40
codegen_flags: <defaults>
</compile_context>

<pallas_src>
import functools

import jax
import jax.numpy as jnp
from jax.experimental import pallas as pl
from jax.experimental.pallas import tpu as pltpu


def _round_up(x, m):
    return ((x + m - 1) // m) * m


# ----------------------------------------------------------------------------
# Fused SFU kernel: one packed r|g projection + nonlinearities + gated blend
# ----------------------------------------------------------------------------
def _sfu_kernel(x_ref, f_ref, wx_ref, wf_ref, b_ref, o_ref,
                *, input_size, compute_dtype):
    x = x_ref[...]                                  # (tm, In) f32 — kept for blend
    xc = x.astype(compute_dtype)
    fc = f_ref[...].astype(compute_dtype)

    # [r_pre | g_pre] = x @ [Wr_x|Wg_x] + fusions @ [Wr_f|Wg_f] + [b_r|b_g]
    # (concat along the input dim eliminated; r/g fused along the output dim)
    pre = (jnp.dot(xc, wx_ref[...], preferred_element_type=jnp.float32)
           + jnp.dot(fc, wf_ref[...], preferred_element_type=jnp.float32)
           + b_ref[...])                            # (tm, 2*In) f32

    r_pre = pre[:, :input_size]                     # lane-aligned split (In = k*128)
    g_pre = pre[:, input_size:]

    r = jnp.tanh(r_pre)                             # EUP
    # sigmoid(x) == 0.5*(tanh(x/2)+1): single EUP push instead of exp + recip.
    g = 0.5 * (jnp.tanh(0.5 * g_pre) + 1.0)

    # o = g*r + (1-g)*x  ==  x + g*(r - x)   (saves one mul + one sub per elem)
    o_ref[...] = (x + g * (r - x)).astype(o_ref.dtype)


def _choose_row_tile(m, max_block_rows):
    """Row tile: multiple of 8, <= max_block_rows, and (when possible) chosen so
    the padded grid has at least 2 steps for v7x's two TensorCores."""
    if m <= 8:
        return 8
    return min(max_block_rows, _round_up(pl.cdiv(m, 2), 8))


def sfu_forward(x, fusions, params, *, compute_dtype=jnp.bfloat16,
                max_block_rows=1024):
    """x: (B, S, In) f32, fusions: (B, S, Fu) f32 -> (B, S, In) f32."""
    B, S, In = x.shape
    Fu = fusions.shape[-1]
    assert fusions.shape[:2] == (B, S)
    M = B * S

    # --- Pack & pre-cast parameters ONCE in HBM (no per-grid-step casts) -----
    wx = jnp.concatenate([params['wr_x'], params['wg_x']], axis=1).astype(compute_dtype)  # (In, 2In)
    wf = jnp.concatenate([params['wr_f'], params['wg_f']], axis=1).astype(compute_dtype)  # (Fu, 2In)
    b = jnp.concatenate([params['b_r'], params['b_g']], axis=1)                           # (1, 2In) f32

    x2 = x.reshape(M, In)
    f2 = fusions.reshape(M, Fu)

    # --- Row tiling with padding (always (8,128)-aligned blocks) -------------
    tm = _choose_row_tile(M, max_block_rows)
    Mp = _round_up(M, tm)
    if Mp != M:
        pad = Mp - M
        x2 = jnp.pad(x2, ((0, pad), (0, 0)))
        f2 = jnp.pad(f2, ((0, pad), (0, 0)))
    grid = (Mp // tm,)

    kernel = functools.partial(_sfu_kernel, input_size=In,
                               compute_dtype=compute_dtype)

    def const(shape):
        return pl.BlockSpec(shape, lambda i: (0, 0))   # grid-invariant block

    out = pl.pallas_call(
        kernel,
        out_shape=jax.ShapeDtypeStruct((Mp, In), x.dtype),
        grid=grid,
        in_specs=[
            pl.BlockSpec((tm, In), lambda i: (i, 0)),   # x rows
            pl.BlockSpec((tm, Fu), lambda i: (i, 0)),   # fusion rows
            const((In, 2 * In)),                        # packed [Wr_x | Wg_x]
            const((Fu, 2 * In)),                        # packed [Wr_f | Wg_f]
            const((1, 2 * In)),                         # packed [b_r  | b_g ]
        ],
        out_specs=pl.BlockSpec((tm, In), lambda i: (i, 0)),
        compiler_params=pltpu.CompilerParams(
            dimension_semantics=("parallel",)),         # shard rows on v7x's 2 TCs
        # Footprint at tm<=1024 with these feature sizes is a few MiB, well under
        # every chip's default scoped VMEM limit — no vmem_limit_bytes needed.
    )(x2, f2, wx, wf, b)

    if Mp != M:
        out = out[:M]
    return out.reshape(B, S, In)


# ----------------------------------------------------------------------------
# Parameter init (PyTorch nn.Linear default: U(-1/sqrt(fan_in), 1/sqrt(fan_in)))
# Weights stored transposed (in_features, out_features) and split into the
# x-part (first In rows) and fusion-part (last Fu rows).
# ----------------------------------------------------------------------------
def init_sfu_params(key, input_size, fusion_size):
    total = input_size + fusion_size
    bound = float(total) ** -0.5
    kr_w, kr_b, kg_w, kg_b = jax.random.split(key, 4)

    def uni(k, shape):
        return jax.random.uniform(k, shape, jnp.float32, -bound, bound)

    wr = uni(kr_w, (total, input_size))
    wg = uni(kg_w, (total, input_size))
    return dict(
        wr_x=wr[:input_size], wr_f=wr[input_size:], b_r=uni(kr_b, (1, input_size)),
        wg_x=wg[:input_size], wg_f=wg[input_size:], b_g=uni(kg_b, (1, input_size)),
    )


# ----------------------------------------------------------------------------
# Pure-JAX reference (mirrors the PyTorch forward literally, with the concat)
# ----------------------------------------------------------------------------
def sfu_reference(x, fusions, params):
    wr = jnp.concatenate([params['wr_x'], params['wr_f']], axis=0)
    wg = jnp.concatenate([params['wg_x'], params['wg_f']], axis=0)
    r_f = jnp.concatenate([x, fusions], axis=2)
    r = jnp.tanh(r_f @ wr + params['b_r'])
    g = jax.nn.sigmoid(r_f @ wg + params['b_g'])
    return g * r + (1.0 - g) * x


if __name__ == "__main__":
    key = jax.random.PRNGKey(0)
    pkey, xkey, fkey = jax.random.split(key, 3)

    B, S = 2, 8
    INPUT, FUSION = 128, 256          # lane-dense feature dims

    params = init_sfu_params(pkey, INPUT, FUSION)
    x = jax.random.normal(xkey, (B, S, INPUT), jnp.float32)
    fusions = jax.random.normal(fkey, (B, S, FUSION), jnp.float32)

    ref = sfu_reference(x, fusions, params)

    # Default (bf16 matmul operands, f32 accumulation): relaxed tolerance.
    out_bf16 = jax.jit(sfu_forward)(x, fusions, params)
    out_bf16 = jax.block_until_ready(out_bf16)
    assert out_bf16.shape == (B, S, INPUT), out_bf16.shape
    assert bool(jnp.all(jnp.isfinite(out_bf16)))
    assert bool(jnp.allclose(out_bf16, ref, atol=2e-2, rtol=2e-2)), \
        float(jnp.max(jnp.abs(out_bf16 - ref)))

    # Exact-fidelity f32 path: tight tolerance against the reference.
    out_f32 = jax.jit(functools.partial(sfu_forward,
                                        compute_dtype=jnp.float32))(x, fusions, params)
    out_f32 = jax.block_until_ready(out_f32)
    assert bool(jnp.allclose(out_f32, ref, atol=1e-4, rtol=1e-4)), \
        float(jnp.max(jnp.abs(out_f32 - ref)))

    print("KERNEL_OK")
</pallas_src>

<mosaic_0001>
module attributes {stable_mosaic.version = 11 : i64} {
  func.func @_sfu_kernel(%arg0: i32, %arg1: memref<8x128xf32, #tpu.memory_space<vmem>>, %arg2: memref<8x256xf32, #tpu.memory_space<vmem>>, %arg3: memref<128x256xbf16, #tpu.memory_space<vmem>>, %arg4: memref<256x256xbf16, #tpu.memory_space<vmem>>, %arg5: memref<1x256xf32, #tpu.memory_space<vmem>>, %arg6: memref<8x128xf32, #tpu.memory_space<vmem>>) attributes {dimension_semantics = [#tpu.dimension_semantics<parallel>], iteration_bounds = array<i64: 2>, scalar_prefetch = 0 : i64, scratch_operands = 0 : i64, tpu.core_type = #tpu.core_type<tc>, window_params = [{transform_indices = @transform_0, window_bounds = array<i64: 8, 128>}, {transform_indices = @transform_1, window_bounds = array<i64: 8, 256>}, {pipeline_mode = #tpu.pipeline_mode<synchronous>, transform_indices = @transform_2, window_bounds = array<i64: 128, 256>}, {pipeline_mode = #tpu.pipeline_mode<synchronous>, transform_indices = @transform_3, window_bounds = array<i64: 256, 256>}, {pipeline_mode = #tpu.pipeline_mode<synchronous>, transform_indices = @transform_4, window_bounds = array<i64: 1, 256>}, {transform_indices = @transform_5, window_bounds = array<i64: 8, 128>}]} {
    %c0 = arith.constant 0 : index
    %c0_0 = arith.constant 0 : index
    %0 = vector.load %arg1[%c0, %c0_0] : memref<8x128xf32, #tpu.memory_space<vmem>>, vector<8x128xf32>
    %1 = arith.truncf %0 : vector<8x128xf32> to vector<8x128xbf16>
    %c0_1 = arith.constant 0 : index
    %c0_2 = arith.constant 0 : index
    %2 = vector.load %arg2[%c0_1, %c0_2] : memref<8x256xf32, #tpu.memory_space<vmem>>, vector<8x256xf32>
    %3 = arith.truncf %2 : vector<8x256xf32> to vector<8x256xbf16>
    %c0_3 = arith.constant 0 : index
    %c0_4 = arith.constant 0 : index
    %4 = vector.load %arg3[%c0_3, %c0_4] : memref<128x256xbf16, #tpu.memory_space<vmem>>, vector<128x256xbf16>
    %cst = arith.constant dense<0.000000e+00> : vector<8x256xf32>
    %5 = tpu.matmul %1, %4, %cst {dimension_numbers = #tpu.dot_dimension_numbers<[1], [0], [0], [1], [0, 0, 1, 1], [], []>} : vector<8x128xbf16>, vector<128x256xbf16>, vector<8x256xf32> -> vector<8x256xf32>
    %c0_5 = arith.constant 0 : index
    %c0_6 = arith.constant 0 : index
    %6 = vector.load %arg4[%c0_5, %c0_6] : memref<256x256xbf16, #tpu.memory_space<vmem>>, vector<256x256xbf16>
    %cst_7 = arith.constant dense<0.000000e+00> : vector<8x256xf32>
    %7 = tpu.matmul %3, %6, %cst_7 {dimension_numbers = #tpu.dot_dimension_numbers<[1], [0], [0], [1], [0, 0, 1, 1], [], []>} : vector<8x256xbf16>, vector<256x256xbf16>, vector<8x256xf32> -> vector<8x256xf32>
    %8 = arith.addf %5, %7 : vector<8x256xf32>
    %c0_8 = arith.constant 0 : index
    %c0_9 = arith.constant 0 : index
    %9 = vector.load %arg5[%c0_8, %c0_9] : memref<1x256xf32, #tpu.memory_space<vmem>>, vector<1x256xf32>
    %10 = vector.broadcast %9 : vector<1x256xf32> to vector<8x256xf32>
    %11 = arith.addf %8, %10 : vector<8x256xf32>
    %12 = vector.extract_strided_slice %11 {offsets = [0, 0], sizes = [8, 128], strides = [1, 1]} : vector<8x256xf32> to vector<8x128xf32>
    %13 = vector.extract_strided_slice %11 {offsets = [0, 128], sizes = [8, 128], strides = [1, 1]} : vector<8x256xf32> to vector<8x128xf32>
    %14 = math.tanh %12 : vector<8x128xf32>
    %cst_10 = arith.constant 5.000000e-01 : f32
    %15 = vector.broadcast %cst_10 : f32 to vector<8x128xf32>
    %16 = arith.mulf %15, %13 : vector<8x128xf32>
    %17 = math.tanh %16 : vector<8x128xf32>
    %cst_11 = arith.constant 1.000000e+00 : f32
    %18 = vector.broadcast %cst_11 : f32 to vector<8x128xf32>
    %19 = arith.addf %17, %18 : vector<8x128xf32>
    %cst_12 = arith.constant 5.000000e-01 : f32
    %20 = vector.broadcast %cst_12 : f32 to vector<8x128xf32>
    %21 = arith.mulf %20, %19 : vector<8x128xf32>
    %22 = arith.subf %14, %0 : vector<8x128xf32>
    %23 = arith.mulf %21, %22 : vector<8x128xf32>
    %24 = arith.addf %0, %23 : vector<8x128xf32>
    %c0_13 = arith.constant 0 : index
    %c0_14 = arith.constant 0 : index
    %25 = vector.load %arg6[%c0_13, %c0_14] : memref<8x128xf32, #tpu.memory_space<vmem>>, vector<8x128xf32>
    tpu.vector_store %arg6[%c0_13, %c0_14], %24 {strides = array<i32>} : memref<8x128xf32, #tpu.memory_space<vmem>>, vector<8x128xf32>,
    return
  }
  func.func @transform_0(%arg0: i32) -> (i32, i32) {
    %c0_i32 = arith.constant 0 : i32
    %c0_i32_0 = arith.constant 0 : i32
    return %arg0, %c0_i32 : i32, i32
  }
  func.func @transform_1(%arg0: i32) -> (i32, i32) {
    %c0_i32 = arith.constant 0 : i32
    %c0_i32_0 = arith.constant 0 : i32
    return %arg0, %c0_i32 : i32, i32
  }
  func.func @transform_2(%arg0: i32) -> (i32, i32) {
    %c0_i32 = arith.constant 0 : i32
    %c0_i32_0 = arith.constant 0 : i32
    %c0_i32_1 = arith.constant 0 : i32
    return %c0_i32, %c0_i32_0 : i32, i32
  }
  func.func @transform_3(%arg0: i32) -> (i32, i32) {
    %c0_i32 = arith.constant 0 : i32
    %c0_i32_0 = arith.constant 0 : i32
    %c0_i32_1 = arith.constant 0 : i32
    return %c0_i32, %c0_i32_0 : i32, i32
  }
  func.func @transform_4(%arg0: i32) -> (i32, i32) {
    %c0_i32 = arith.constant 0 : i32
    %c0_i32_0 = arith.constant 0 : i32
    %c0_i32_1 = arith.constant 0 : i32
    return %c0_i32, %c0_i32_0 : i32, i32
  }
  func.func @transform_5(%arg0: i32) -> (i32, i32) {
    %c0_i32 = arith.constant 0 : i32
    %c0_i32_0 = arith.constant 0 : i32
    return %arg0, %c0_i32 : i32, i32
  }
}

</mosaic_0001>

<bundles_post_ra>
// kernel: sfu_forward.1
= control target key start
LH: loop header
LB: loop body
LE: loop exit
PB: predicated region body
PF: predicated region fallthrough
CT: control target
= control target key end

     0   :  { %10 = vsyncpa [#allocation3], 0  ;;  %s1243_s0 = inlined_call_operand.vmem [shape: f32[16,128], index: 0, kind: input, shape index: {}]   ;;  %s1244_s1 = inlined_call_operand.vmem [shape: f32[16,256], index: 1, kind: input, shape index: {}]   ;;  %s1245_s2 = inlined_call_operand.vmem [shape: bf16[128,256], index: 2, kind: input, shape index: {}]   ;;  %s1246_s3 = inlined_call_operand.vmem [shape: bf16[256,256], index: 3, kind: input, shape index: {}]   ;;  %s1247_s4 = inlined_call_operand.vmem [shape: f32[1,256], index: 4, kind: input, shape index: {}]   ;;  %s1248_s5 = inlined_call_operand.hbm [shape: f32[16,128], index: 5, kind: output, shape index: {}]  }
   0x1   :  { %12 = vsyncpa [#allocation3 + $0x1], 0  ;;  %s996_s18 = smov 0   ;;  %s998_s19 = smov 0  }
   0x2   :  { %s1000_s20 = smov 0   ;;  %s1002_s21 = smov 0  }
   0x3 LB: > { %s1017_s22 = sadd.s32 4294967295, %s962_s21   ;;  %s725_s23 = sadd.s32 4294967294, %s962_s21   ;;  %s962_s21 = sphi %s1002_s21, %s1254_s21   ;;  %s958_s20 = sphi %s1000_s20, %s1253_s20   ;;  %s954_s19 = sphi %s998_s19, %s1252_s19   ;;  %s950_s18 = sphi %s996_s18, %s1251_s18  }
   0x4   : > { %s1021_s24 = sadd.s32 1, %s962_s21   ;;  %s140_s25 = sadd.s32 1, %s958_s20 }
   0x5   : > { %s137_s26 = ssub.s32 %s962_s21, %s1021_s24  ;;  %p150_p0 = scmp.ne.s32.totalorder %s958_s20, %s954_s19 }
   0x6   : > { %p138_p1 = scmp.eq.s32.totalorder %s137_s26, 0  ;;  %p151_p2 = scmp.eq.s32.totalorder %s1017_s22, 1 }
   0x7   : > { %p156_p3 = scmp.ne.s32.totalorder %s954_s19, %s950_s18  ;;  %p157_p4 = scmp.eq.s32.totalorder %s725_s23, 1 }
   0x8   : > { %s1032_s27 = scalar_select %p138_p1, %s958_s20, %s140_s25  }
   0x9   : > { %p1034_p5 = por %p151_p2, %p150_p0  ;;  %p1038_p6 = por %p157_p4, %p156_p3 }
   0xa   : > { %p728_p7 = scmp.ge.s32.totalorder %s962_s21, 1  ;;  %p199_p8 = scmp.lt.s32.totalorder %s962_s21, 3 }
   0xc   : > { %p200_p9 = pnand %p728_p7, %p199_p8 }
   0xd   : > { %p231_p10 = scmp.lt.s32.totalorder (!%p200_p9), %s1017_s22, 1  ;;  %s782_s26 = sshll.u32 (!%p200_p9), %s1017_s22, 7 }
   0xe   : > { %203 = sbr.rel (%p200_p9) target bundleno = 320 (0x140), region = 40  ;;  %s965_s13 = smov (!%p200_p9), [#allocation2]  }
   0xf   : > { %s906_s14 = sshll.u32 (!%p200_p9), %s965_s13, 4  ;;  %s907_s14 = int_to_ptr.vmem [resolvable:$false] %s906_s14 }
  0x13   : > { %v826_v0 = vld [vmem:[%s1246_s3 + $0x74] ss:$8 sps:$4 sm:$0xff]   ;;  %v828_v1 = vld [vmem:[%s1246_s3 + $0x70] ss:$8 sps:$4 sm:$0xff]   ;;  %v964_v2 = vmov 0   ;;  %s232_s30 = scalar_select %p231_p10, %s1017_s22, 1  ;;  %v619_v59 = vlaneseq }
  0x14   : > { %608 = vmatprep.mubr.bf16.mxu1 %v964_v2  ;;  %455 = vmatprep.subr.bf16.mxu0 %v826_v0  ;;  %v829_v3 = vld [vmem:[%s1246_s3 + $0x64] ss:$8 sps:$4 sm:$0xff]   ;;  %v831_v4 = vld [vmem:[%s1246_s3 + $0x60] ss:$8 sps:$4 sm:$0xff]   ;;  %v832_v5 = vld [vmem:[%s1246_s3 + $0x54] ss:$8 sps:$4 sm:$0xff]  }
  0x15   : > { %456 = vmatpush1.bf16.msra.mxu0 %v828_v1  ;;  %v834_v6 = vld [vmem:[%s1246_s3 + $0x50] ss:$8 sps:$4 sm:$0xff]   ;;  %v835_v7 = vld [vmem:[%s1246_s3 + $0x44] ss:$8 sps:$4 sm:$0xff]   ;;  %v847_v8 = vld [vmem:[%s1245_s2 + $0x74] ss:$8 sps:$4 sm:$0xff]  }
  0x16   : > { %457 = vmatprep.subr.bf16.mxu0 %v829_v3  ;;  %v849_v9 = vld [vmem:[%s1245_s2 + $0x70] ss:$8 sps:$4 sm:$0xff]   ;;  %v837_v10 = vld [vmem:[%s1246_s3 + $0x40] ss:$8 sps:$4 sm:$0xff]   ;;  %v838_v11 = vld [vmem:[%s1246_s3 + $0x34] ss:$8 sps:$4 sm:$0xff]   ;;  %576 = vmatprep.subr.bf16.mxu1 %v847_v8 }
  0x17   : > { %v853_v12 = vld [vmem:[%s1245_s2 + $0x64] ss:$8 sps:$4 sm:$0xff]   ;;  %577 = vmatpush1.bf16.msra.mxu1 %v849_v9  ;;  %v855_v13 = vld [vmem:[%s1245_s2 + $0x60] ss:$8 sps:$4 sm:$0xff]   ;;  %v840_v14 = vld [vmem:[%s1246_s3 + $0x30] ss:$8 sps:$4 sm:$0xff]  }
  0x18   : > { %578 = vmatprep.subr.bf16.mxu1 %v853_v12  ;;  %v859_v15 = vld [vmem:[%s1245_s2 + $0x54] ss:$8 sps:$4 sm:$0xff]   ;;  %v841_v16 = vld [vmem:[%s1246_s3 + $0x24] ss:$8 sps:$4 sm:$0xff]   ;;  %v861_v17 = vld [vmem:[%s1245_s2 + $0x50] ss:$8 sps:$4 sm:$0xff]  }
  0x19   : > { %458 = vmatpush1.bf16.msra.mxu0 %v831_v4  ;;  %v865_v18 = vld [vmem:[%s1245_s2 + $0x44] ss:$8 sps:$4 sm:$0xff]   ;;  %v843_v19 = vld [vmem:[%s1246_s3 + $0x20] ss:$8 sps:$4 sm:$0xff]   ;;  %v844_v20 = vld [vmem:[%s1246_s3 + $0x14] ss:$8 sps:$4 sm:$0xff]  }
  0x1a   : > { %459 = vmatprep.subr.bf16.mxu0 %v832_v5  ;;  %v867_v21 = vld [vmem:[%s1245_s2 + $0x40] ss:$8 sps:$4 sm:$0xff]   ;;  %v871_v22 = vld [vmem:[%s1245_s2 + $0x34] ss:$8 sps:$4 sm:$0xff]   ;;  %v846_v23 = vld [vmem:[%s1246_s3 + $0x10] ss:$8 sps:$4 sm:$0xff]  }
  0x1b   : > { %579 = vmatpush1.bf16.msra.mxu1 %v855_v13  ;;  %v850_v24 = vld [vmem:[%s1246_s3 + $0x4] ss:$8 sps:$4 sm:$0xff]   ;;  %v873_v25 = vld [vmem:[%s1245_s2 + $0x30] ss:$8 sps:$4 sm:$0xff]   ;;  %s785_s10 = sshll.u32 %s232_s30, 4  ;;  %s730_s9 = sshll.u32 %s232_s30, 3 }
  0x1c   : > { %580 = vmatprep.subr.bf16.mxu1 %v859_v15  ;;  %v877_v26 = vld [vmem:[%s1245_s2 + $0x24] ss:$8 sps:$4 sm:$0xff]   ;;  %v852_v27 = vld [vmem:[%s1246_s3] ss:$8 sps:$4 sm:$0xff]   ;;  %v856_v28 = vld [vmem:[%s1246_s3 + $0xf4] ss:$8 sps:$4 sm:$0xff]   ;;  %s1136_s25 = scalar_lea.vmem %s1244_s1, %s785_s10  ;;  %s234_s30 = scalar_lea.vmem %s1243_s0, %s730_s9 }
  0x1d   : > { %460 = vmatpush1.bf16.msra.mxu0 %v834_v6  ;;  %v879_v29 = vld [vmem:[%s1245_s2 + $0x20] ss:$8 sps:$4 sm:$0xff]   ;;  %v883_v30 = vld [vmem:[%s1245_s2 + $0x14] ss:$8 sps:$4 sm:$0xff]   ;;  %v858_v31 = vld [vmem:[%s1246_s3 + $0xf0] ss:$8 sps:$4 sm:$0xff]   ;;  %s652_s9 = scalar_lea.hbm %s1248_s5, %s782_s26 }
  0x1e   : > { %461 = vmatprep.subr.bf16.mxu0 %v835_v7  ;;  %v862_v32 = vld [vmem:[%s1246_s3 + $0xe4] ss:$8 sps:$4 sm:$0xff]   ;;  %v885_v34 = vld [vmem:[%s1245_s2 + $0x10] ss:$8 sps:$4 sm:$0xff]   ;;  %v864_v37 = vld [vmem:[%s1246_s3 + $0xe0] ss:$8 sps:$4 sm:$0xff]  }
  0x1f   : > { %581 = vmatpush1.bf16.msra.mxu1 %v861_v17  ;;  %v244_v33 = vld [vmem:[%s1136_s25 + $0x8] sm:$0xff]  ;;  %v868_v38 = vld [vmem:[%s1246_s3 + $0xd4] ss:$8 sps:$4 sm:$0xff]   ;;  %v1166_v40 = vld [vmem:[%s234_s30] sm:$0xff]  ;;  %v620_v60 = vshrl.u32 %v619_v59, 7  ;;  %s908_s22 = scalar_lea.vmem %s907_s14, 256 }
  0x20   : > { %582 = vmatprep.subr.bf16.mxu1 %v865_v18  ;;  %v246_v35 = vpack.c.bf16 %v244_v33, %v244_v33  ;;  %v889_v36 = vld [vmem:[%s1245_s2 + $0x4] ss:$8 sps:$4 sm:$0xff]   ;;  %v891_v39 = vld [vmem:[%s1245_s2] ss:$8 sps:$4 sm:$0xff]   ;;  %v870_v41 = vld [vmem:[%s1246_s3 + $0xd0] ss:$8 sps:$4 sm:$0xff]   ;;  %v242_v43 = vpack.c.bf16 %v1166_v40, %v1166_v40 }
  0x21   : > { %462 = vmatpush1.bf16.msra.mxu0 %v837_v10  ;;  %v874_v42 = vld [vmem:[%s1246_s3 + $0xc4] ss:$8 sps:$4 sm:$0xff]   ;;  %v876_v44 = vld [vmem:[%s1246_s3 + $0xc0] ss:$8 sps:$4 sm:$0xff]   ;;  %v880_v45 = vld [vmem:[%s1246_s3 + $0xb4] ss:$8 sps:$4 sm:$0xff]  }
  0x22   : > { %463 = vmatprep.subr.bf16.mxu0 %v838_v11  ;;  %487 = vmatprep.mubr.bf16.mxu0 %v246_v35  ;;  %v882_v46 = vld [vmem:[%s1246_s3 + $0xb0] ss:$8 sps:$4 sm:$0xff]   ;;  %v886_v47 = vld [vmem:[%s1246_s3 + $0xa4] ss:$8 sps:$4 sm:$0xff]   ;;  %v888_v48 = vld [vmem:[%s1246_s3 + $0xa0] ss:$8 sps:$4 sm:$0xff]  }
  0x23   : > { %583 = vmatpush1.bf16.msra.mxu1 %v867_v21  ;;  %v892_v49 = vld [vmem:[%s1246_s3 + $0x94] ss:$8 sps:$4 sm:$0xff]   ;;  %v894_v50 = vld [vmem:[%s1246_s3 + $0x90] ss:$8 sps:$4 sm:$0xff]   ;;  %v895_v51 = vld [vmem:[%s1246_s3 + $0x84] ss:$8 sps:$4 sm:$0xff]  }
  0x24   : > { %584 = vmatprep.subr.bf16.mxu1 %v871_v22  ;;  %v897_v52 = vld [vmem:[%s1246_s3 + $0x80] ss:$8 sps:$4 sm:$0xff]   ;;  %v621_v61 = vsub.s32 0, %v620_v60  ;;  %v625_v63 = vsub.s32 1, %v620_v60 }
  0x25   : > { %464 = vmatpush1.bf16.msra.mxu0 %v840_v14  ;;  %v243_v53 = vld [vmem:[%s1136_s25] sm:$0xff]  ;;  %s228_s25 = sand.u32 1, %s954_s19  }
  0x26   : > { %465 = vmatprep.subr.bf16.mxu0 %v841_v16  ;;  %v245_v54 = vpack.c.bf16 %v243_v53, %v243_v53  ;;  %v617_v62 = vld [vmem:[%s1247_s4] sm:$0x3]  ;;  %s729_s23 = sshll.u32 %s228_s25, 3  ;;  %s641_s12 = scalar_lea.sflag [#allocation3], %s228_s25 }
  0x27   : > { %585 = vmatpush1.bf16.msra.mxu1 %v873_v25  ;;  %v622_v1 = vrot.slane %v617_v62, %v621_v61  ;;  %v626_v3 = vrot.slane %v617_v62, %v625_v63  ;;  %s230_s6 = scalar_lea.vmem [#allocation2], %s729_s23 }
  0x28   : > { %586 = vmatprep.subr.bf16.mxu1 %v877_v26  ;;  %s654_s7 = sshll.u32 %s230_s6, 4  ;;  %s655_s7 = int_to_ptr.vmem [resolvable:$true] %s654_s7 }
  0x29   : > { %466 = vmatpush1.bf16.msra.mxu0 %v843_v19  ;;  %s902_s10 = scalar_lea.vmem %s655_s7, 128  ;;  %p909_p0 = scmp.lt.s32.totalorder %s655_s7, %s907_s14 }
  0x2a   : > { %467 = vmatprep.subr.bf16.mxu0 %v844_v20  ;;  %p903_p11 = scmp.ne.s32.totalorder %s655_s7, %s902_s10  ;;  %p910_p1 = scmp.lt.s32.totalorder %s908_s22, %s902_s10 }
  0x2b   : > { %587 = vmatpush1.bf16.msra.mxu1 %v879_v29 }
  0x2c   : > { %588 = vmatprep.subr.bf16.mxu1 %v883_v30  ;;  %p904_p12 = pnand %p903_p11, %p1034_p5  ;;  %p911_p2 = por %p910_p1, %p909_p0 }
  0x2d   : > { %468 = vmatpush1.bf16.msra.mxu0 %v846_v23 }
  0x2e   : > { %469 = vmatprep.subr.bf16.mxu0 %v850_v24  ;;  %p905_p13 = pneg %p904_p12 }
  0x2f   : > { %589 = vmatpush1.bf16.msra.mxu1 %v885_v34 }
  0x30   : > { %590 = vmatprep.subr.bf16.mxu1 %v889_v36  ;;  %p912_p3 = pnand %p911_p2, %p905_p13 }
  0x31   : > { %470 = vmatpush1.bf16.msra.mxu0 %v852_v27 }
  0x32   : > { %471 = vmatprep.subr.bf16.mxu0 %v856_v28 }
  0x33   : > { %591 = vmatpush1.bf16.msra.mxu1 %v891_v39 }
  0x35   : > { %472 = vmatpush2.bf16.msra.mxu0 %v858_v31 }
  0x36   : > { %473 = vmatprep.subr.bf16.mxu0 %v862_v32  ;;  %609 = vmatmul.mubr.bf16.vlgmr.msra.gmra.mxu1 %v242_v43 }
  0x39   : > { %474 = vmatpush2.bf16.msra.mxu0 %v864_v37 }
  0x3a   : > { %475 = vmatprep.subr.bf16.mxu0 %v868_v38 }
  0x3d   : > { %476 = vmatpush2.bf16.msra.mxu0 %v870_v41 }
  0x3e   : > { %477 = vmatprep.subr.bf16.mxu0 %v874_v42 }
  0x41   : > { %478 = vmatpush2.bf16.msra.mxu0 %v876_v44 }
  0x42   : > { %479 = vmatprep.subr.bf16.mxu0 %v880_v45 }
  0x45   : > { %480 = vmatpush2.bf16.msra.mxu0 %v882_v46 }
  0x46   : > { %481 = vmatprep.subr.bf16.mxu0 %v886_v47 }
  0x49   : > { %482 = vmatpush2.bf16.msra.mxu0 %v888_v48 }
  0x4a   : > { %483 = vmatprep.subr.bf16.mxu0 %v892_v49 }
  0x4d   : > { %484 = vmatpush2.bf16.msra.mxu0 %v894_v50 }
  0x4e   : > { %485 = vmatprep.subr.bf16.mxu0 %v895_v51 }
  0x51   : > { %486 = vmatpush2.bf16.msra.mxu0 %v897_v52 }
  0x54   : > { %488 = vmatmul.mubr.bf16.vlgmr.msra.gmra.mxu0 %v245_v54 }
  0xf6   : > { %v610_v55 = vpop.f32.mrf.mxu1 }
  0xf8   : > { %v612_v56 = vpop.f32.mrf.mxu1 }
  0xfa   : > { %v614_v57 = vpop.f32.mrf.mxu1 }
  0xfc   : > { %v615_v58 = vpop.f32.mrf.mxu1 }
 0x114   : > { %v489_v0 = vpop.f32.mrf.mxu0 }
 0x115   : > { %v611_v2 = vadd.f32 %v610_v55, %v489_v0 }
 0x116   : > { %v491_v4 = vpop.f32.mrf.mxu0 }
 0x117   : > { %v613_v5 = vadd.f32 %v612_v56, %v491_v4  ;;  %v629_v6 = vadd.f32 %v622_v1, %v611_v2 }
 0x118   : > { %v493_v7 = vpop.f32.mrf.mxu0 }
 0x119   : > { %v630_v8 = vadd.f32 %v626_v3, %v613_v5  ;;  %898 = vtanh.f32 %v629_v6 }
 0x11a   : > { %v494_v9 = vpop.f32.mrf.mxu0 }
 0x11b   : > { %v632_v10 = vmul.f32 0.5, %v630_v8 }
 0x11d   : > { %900 = vtanh.f32 %v632_v10 }
 0x126   : > { %v899_v11 = vpop.eup %898 }
 0x127   : > { %v636_v15 = vsub.f32 %v899_v11, %v1166_v40 }
 0x12a   : > { %v901_v12 = vpop.eup %900 }
 0x12b   : > { %v634_v13 = vadd.f32 1.0, %v901_v12 }
 0x12d   : > { %v635_v14 = vmul.f32 0.5, %v634_v13 }
 0x12f   : > { %v637_v16 = vmul.f32 %v636_v15, %v635_v14 }
 0x131   : > { %v638_v17 = vadd.f32 %v637_v16, %v1166_v40 }
 0x133   : > { %639 = vst [vmem:[%s230_s6] sm:$0xff] %v638_v17 }
 0x134   : > { %915 = shalt.err (!%p912_p3)
}
 0x135   : > { %s916_s15 = scalar_lea.hbm %s652_s9, 128  ;;  %s920_s30 = scalar_lea.hbm %s1248_s5, 256 }
 0x136   : > { %p917_p4 = scmp.ne.s32.totalorder %s652_s9, %s916_s15  ;;  %p921_p9 = scmp.lt.s32.totalorder %s652_s9, %s1248_s5 }
 0x137   : > { %p922_p10 = scmp.lt.s32.totalorder %s920_s30, %s916_s15 }
 0x138   : > { %p918_p7 = pnand %p917_p4, %p1034_p5 }
 0x139   : > { %p923_p11 = por %p922_p10, %p921_p9 }
 0x13a   : > { %p919_p8 = pneg %p918_p7 }
 0x13c   : > { %p924_p12 = pnand %p923_p11, %p919_p8 }
 0x13e   : > { %927 = shalt.err (!%p924_p12)
}
 0x13f   : > { %786 = dma.vmem_to_hbm [thread:$0]  (%p1034_p5), %s655_s7, 128, %s652_s9, %s641_s12  }
 0x140 PF: > { %p792_p13 = scmp.ge.s32.totalorder %s962_s21, 2  ;;  %s666_s26 = sand.u32 1, %s950_s18  }
 0x141   : > { %s667_s6 = scalar_lea.sflag [#allocation3], %s666_s26 }
 0x142   : > { %p789_p0 = pnand %p792_p13, %p1038_p6 }
 0x144   : > { %p790_p1 = pneg %p789_p0 }
 0x146   : > { %945 = dma.done.wait (%p790_p1), %s667_s6, 128  }
 0x147   : > { %947 = vsyncadd (%p790_p1), %s667_s6, 4294967168  ;;  %p15_p2 = scmp.ge.s32.totalorder %s1021_s24, 4   ;;  %s1251_s18 = smov %s954_s19 }
 0x148   : > { %s1252_s19 = smov %s958_s20  ;;  %s1253_s20 = smov %s1032_s27 }
 0x149   : > { %s1254_s21 = smov %s1021_s24  ;;  %17 = sbr.rel (!%p15_p2) target bundleno = 3 (0x3), region = 78 }
 0x14e   :  { %672 = vsyncpa [#allocation3], 1 }
 0x14f   :  { %674 = vsyncpa [#allocation3 + $0x1], 1 }

</bundles_post_ra>
